<compile_context>
chip_gen: v5e
topology: v5e:2x2
jax: 0.10.0
libtpu: 0.0.40
codegen_flags: <defaults>
</compile_context>

<pallas_src>
import functools

import jax
import jax.numpy as jnp
from jax import lax
from jax.experimental import pallas as pl
from jax.experimental.pallas import tpu as pltpu


# -----------------------------------------------------------------------------
# Fused kernel: QKV projection + dual attention + output projection.
# Grid = (batch, query-tile); one invocation handles one (b, tile) pair.
# -----------------------------------------------------------------------------
def _attn_kernel(xq_ref, xkv_ref, wq_ref, wkv_ref, wproj_ref, b_ref,
                 y_ref, y_ori_ref, ctx_scr, *v_scr_opt,
                 num_heads, scale, use_bf16_exp):
    x_q = xq_ref[0]         # (tq, C) bf16 — query-tile rows of x
    x_kv = xkv_ref[0]       # (N , C) bf16 — full sequence (keys / values)
    tq, C = x_q.shape
    N = x_kv.shape[0]
    H = num_heads
    d = C // H

    # ---- projections: lane-dense weight-stationary MXU passes, f32 acc ------
    # `scale` is folded into q here (and into the surgery-branch lhs of v below)
    # so the (tq, N) score matrices are never rescaled.
    q_all = (jnp.dot(x_q, wq_ref[...], preferred_element_type=jnp.float32)
             * scale).astype(jnp.bfloat16)                                    # (tq, C)
    kv = jnp.dot(x_kv, wkv_ref[...],
                 preferred_element_type=jnp.float32).astype(jnp.bfloat16)     # (N, 2C)
    k_all = kv[:, :C]
    v_all = kv[:, C:]

    # Surgery-branch lhs = v restricted to this query tile, pre-scaled.
    if v_scr_opt:                       # tiled over queries (tq < N)
        v_scr, = v_scr_opt
        v_scr[...] = v_all              # stage in VMEM for a dynamic row slice
        row0 = pl.multiple_of(pl.program_id(1) * tq, tq)
        v_lhs_all = v_scr[pl.ds(row0, tq), :] * scale                         # (tq, C)
    else:                               # tq == N: the tile is the whole sequence
        v_lhs_all = v_all * scale

    # Contract on the last dim of both operands (== q @ k.T, no XLU transpose).
    dn = (((1,), (1,)), ((), ()))

    def _attn_context(s, v):
        # Unnormalized softmax; 1/rowsum is applied to the (tq, d) context after
        # p@v (N*d multiplies instead of N*N).
        m = jnp.max(s, axis=-1, keepdims=True)
        z = s - m
        if use_bf16_exp:                # bf16 EUP path (v6e / v7x)
            e = jnp.exp(z.astype(jnp.bfloat16))
        else:                           # v5e and older: f32 EUP only
            e = jnp.exp(z).astype(jnp.bfloat16)
        denom = jnp.sum(e.astype(jnp.float32), axis=-1, keepdims=True)        # f32 sum
        ctx = jnp.dot(e, v, preferred_element_type=jnp.float32)               # (tq, d)
        return ctx * pl.reciprocal(denom, approx=True)

    for h in range(H):
        cs = slice(h * d, (h + 1) * d)
        q = q_all[:, cs]                # (tq, d) pre-scaled
        k = k_all[:, cs]                # (N , d)
        v = v_all[:, cs]                # (N , d)
        v_lhs = v_lhs_all[:, cs]        # (tq, d) pre-scaled

        s_ori = lax.dot_general(q, k, dn, preferred_element_type=jnp.float32)      # (tq, N)
        s_new = lax.dot_general(v_lhs, v, dn, preferred_element_type=jnp.float32)  # (tq, N)

        # Store each head as soon as it finishes: no concat, bounded live ranges.
        ctx_scr[0:tq, cs] = _attn_context(s_new, v).astype(jnp.bfloat16)       # surgery
        ctx_scr[tq:2 * tq, cs] = _attn_context(s_ori, v).astype(jnp.bfloat16)  # original

    # Fused output projection: both branches in one weight-stationary MXU pass.
    proj = jnp.dot(ctx_scr[...], wproj_ref[...],
                   preferred_element_type=jnp.float32) + b_ref[...]            # (2tq, C)
    y_ref[0] = proj[:tq]
    y_ori_ref[0] = proj[tq:]


# -----------------------------------------------------------------------------
# Wrapper
# -----------------------------------------------------------------------------
def _bf16_exp_supported():
    # bf16 EUP exists on v6e / v7x; keep f32 exp on v5e and older (safe default).
    try:
        kind = jax.devices()[0].device_kind.lower()
    except Exception:
        return False
    return ("v6" in kind) or ("v7" in kind) or ("7x" in kind)


def _vmem_limit_bytes(N, tq, C):
    bf, f4 = 2, 4
    weights = (C * C + C * 2 * C + C * C) * bf + C * f4
    per_step_io = tq * C * bf + N * C * bf + 2 * tq * C * f4
    pipelined = 2 * (weights + per_step_io)          # default double buffering
    scratch = 2 * tq * C * bf + N * C * bf
    live = (tq * C * (f4 + bf) + N * 2 * C * (f4 + bf)   # q / kv slabs (f32 + bf16)
            + 2 * tq * N * f4                            # two score tiles
            + 2 * tq * C * (f4 + bf))                    # projection in/out
    est = pipelined + scratch + live
    # floor: 32 MiB (v5e scoped default is 16); cap: 64 MiB (v7x physical VMEM).
    return int(max(32 << 20, min(est * 3 // 2, 64 << 20)))


def attention_forward(x, w_qkv, w_proj, b_proj, *, num_heads, q_tile=None):
    """CLIP-Surgery Attention forward.

    x      : (B, N, C) float32
    w_qkv  : (3C, C) float32  (PyTorch nn.Linear weight layout: out, in; no bias)
    w_proj : (C, C)  float32
    b_proj : (C,)    float32
    q_tile : optional query-tile size (must divide N, multiple of 8).  Use at
             large N to bound VMEM and to feed both v7x TensorCores when B==1.
    returns [x, x_ori], each (B, N, C) float32
    """
    B, N, C = x.shape
    H = num_heads
    assert C % H == 0
    d = C // H
    scale = d ** (-0.5)

    tq = N if q_tile is None else int(q_tile)
    if tq != N:
        assert N % tq == 0 and tq % 8 == 0, "q_tile must divide N and be a multiple of 8"
    n_q_tiles = N // tq

    # One-time weight prep: PyTorch (out, in) -> (in, out); MXU operands in bf16.
    w_q_t = jnp.transpose(w_qkv[:C]).astype(jnp.bfloat16)        # (C, C)
    w_kv_t = jnp.transpose(w_qkv[C:]).astype(jnp.bfloat16)       # (C, 2C) = [Wk | Wv]
    w_proj_t = jnp.transpose(w_proj).astype(jnp.bfloat16)        # (C, C)
    b_proj_2d = b_proj.reshape(1, C).astype(jnp.float32)
    x_bf = x.astype(jnp.bfloat16)

    scratch_shapes = [pltpu.VMEM((2 * tq, C), jnp.bfloat16)]     # per-head contexts
    if n_q_tiles > 1:
        scratch_shapes.append(pltpu.VMEM((N, C), jnp.bfloat16))  # staged v (row slicing)

    kernel = functools.partial(_attn_kernel, num_heads=H, scale=scale,
                               use_bf16_exp=_bf16_exp_supported())

    y, y_ori = pl.pallas_call(
        kernel,
        out_shape=(
            jax.ShapeDtypeStruct((B, N, C), jnp.float32),
            jax.ShapeDtypeStruct((B, N, C), jnp.float32),
        ),
        grid_spec=pltpu.PrefetchScalarGridSpec(
            num_scalar_prefetch=0,
            grid=(B, n_q_tiles),
            in_specs=[
                pl.BlockSpec((1, tq, C), lambda b, t: (b, t, 0)),   # x (query tile)
                pl.BlockSpec((1, N, C), lambda b, t: (b, 0, 0)),    # x (full seq -> k, v)
                pl.BlockSpec((C, C), lambda b, t: (0, 0)),          # Wq^T      (resident)
                pl.BlockSpec((C, 2 * C), lambda b, t: (0, 0)),      # [Wk|Wv]^T (resident)
                pl.BlockSpec((C, C), lambda b, t: (0, 0)),          # Wproj^T   (resident)
                pl.BlockSpec((1, C), lambda b, t: (0, 0)),          # proj bias
            ],
            out_specs=[
                pl.BlockSpec((1, tq, C), lambda b, t: (b, t, 0)),   # x (surgery branch)
                pl.BlockSpec((1, tq, C), lambda b, t: (b, t, 0)),   # x_ori
            ],
            scratch_shapes=scratch_shapes,
        ),
        compiler_params=pltpu.CompilerParams(
            dimension_semantics=("parallel", "parallel"),
            vmem_limit_bytes=_vmem_limit_bytes(N, tq, C)),
    )(x_bf, x_bf, w_q_t, w_kv_t, w_proj_t, b_proj_2d)

    return [y, y_ori]


# -----------------------------------------------------------------------------
# Pure-JAX reference (mirrors the PyTorch forward exactly, settings='')
# -----------------------------------------------------------------------------
def attention_reference(x, w_qkv, w_proj, b_proj, *, num_heads):
    B, N, C = x.shape
    H = num_heads
    d = C // H
    scale = d ** (-0.5)

    qkv = x @ w_qkv.T
    qkv = qkv.reshape(B, N, 3, H, d).transpose(2, 0, 3, 1, 4)
    q, k, v = qkv[0], qkv[1], qkv[2]                    # (B, H, N, d)

    attn_ori = jax.nn.softmax(jnp.einsum('bhnd,bhmd->bhnm', q, k) * scale, axis=-1)
    attn = jax.nn.softmax(jnp.einsum('bhnd,bhmd->bhnm', v, v) * scale, axis=-1)

    x_ori = jnp.einsum('bhnm,bhmd->bhnd', attn_ori, v).transpose(0, 2, 1, 3).reshape(B, N, C)
    x_new = jnp.einsum('bhnm,bhmd->bhnd', attn, v).transpose(0, 2, 1, 3).reshape(B, N, C)

    x_new = x_new @ w_proj.T + b_proj
    x_ori = x_ori @ w_proj.T + b_proj
    return [x_new, x_ori]


if __name__ == "__main__":
    def _run_check(B, N, C, H, q_tile):
        key = jax.random.PRNGKey(0)
        kx, kq, kp, kb = jax.random.split(key, 4)
        wstd = 0.5 / (C ** 0.5)
        x = jax.random.normal(kx, (B, N, C), dtype=jnp.float32)
        w_qkv = wstd * jax.random.normal(kq, (3 * C, C), dtype=jnp.float32)  # qkv_bias=False
        w_proj = wstd * jax.random.normal(kp, (C, C), dtype=jnp.float32)
        b_proj = wstd * jax.random.normal(kb, (C,), dtype=jnp.float32)

        fwd = jax.jit(functools.partial(attention_forward, num_heads=H, q_tile=q_tile))
        y, y_ori = fwd(x, w_qkv, w_proj, b_proj)
        jax.block_until_ready(y)
        jax.block_until_ready(y_ori)

        y_ref, y_ori_ref = attention_reference(x, w_qkv, w_proj, b_proj, num_heads=H)
        # bf16 MXU inputs + bf16 exp + approx reciprocal loosen tolerance vs f32 ref.
        for got, ref, name in ((y, y_ref, "x"), (y_ori, y_ori_ref, "x_ori")):
            err = float(jnp.max(jnp.abs(got - ref)))
            assert jnp.allclose(got, ref, atol=2e-2, rtol=2e-2), (
                f"{name} mismatch (B={B},N={N},C={C},H={H},q_tile={q_tile}): max err {err}")

    # Default path: one query tile per batch element (same structure at toy shape).
    _run_check(B=2, N=16, C=32, H=4, q_tile=None)
    # head_dim=64 lane layout + query-tiled grid (2 tiles -> 2nd parallel axis).
    _run_check(B=1, N=64, C=256, H=4, q_tile=32)

    print("KERNEL_OK")
</pallas_src>

<mosaic_0001>
module attributes {stable_mosaic.version = 11 : i64} {
  func.func @_attn_kernel(%arg0: i32, %arg1: i32, %arg2: memref<1x16x32xbf16, #tpu.memory_space<vmem>>, %arg3: memref<1x16x32xbf16, #tpu.memory_space<vmem>>, %arg4: memref<32x32xbf16, #tpu.memory_space<vmem>>, %arg5: memref<32x64xbf16, #tpu.memory_space<vmem>>, %arg6: memref<32x32xbf16, #tpu.memory_space<vmem>>, %arg7: memref<1x32xf32, #tpu.memory_space<vmem>>, %arg8: memref<1x16x32xf32, #tpu.memory_space<vmem>>, %arg9: memref<1x16x32xf32, #tpu.memory_space<vmem>>, %arg10: memref<32x32xbf16, #tpu.memory_space<vmem>>) attributes {dimension_semantics = [#tpu.dimension_semantics<parallel>, #tpu.dimension_semantics<parallel>], iteration_bounds = array<i64: 2, 1>, scalar_prefetch = 0 : i64, scratch_operands = 1 : i64, tpu.core_type = #tpu.core_type<tc>, window_params = [{transform_indices = @transform_0, window_bounds = array<i64: 1, 16, 32>}, {transform_indices = @transform_1, window_bounds = array<i64: 1, 16, 32>}, {pipeline_mode = #tpu.pipeline_mode<synchronous>, transform_indices = @transform_2, window_bounds = array<i64: 32, 32>}, {pipeline_mode = #tpu.pipeline_mode<synchronous>, transform_indices = @transform_3, window_bounds = array<i64: 32, 64>}, {pipeline_mode = #tpu.pipeline_mode<synchronous>, transform_indices = @transform_4, window_bounds = array<i64: 32, 32>}, {pipeline_mode = #tpu.pipeline_mode<synchronous>, transform_indices = @transform_5, window_bounds = array<i64: 1, 32>}, {transform_indices = @transform_6, window_bounds = array<i64: 1, 16, 32>}, {transform_indices = @transform_7, window_bounds = array<i64: 1, 16, 32>}]} {
    %c0 = arith.constant 0 : index
    %c0_0 = arith.constant 0 : index
    %c0_1 = arith.constant 0 : index
    %0 = vector.load %arg2[%c0, %c0_0, %c0_1] : memref<1x16x32xbf16, #tpu.memory_space<vmem>>, vector<1x16x32xbf16>
    %1 = vector.shape_cast %0 : vector<1x16x32xbf16> to vector<16x32xbf16>
    %c0_2 = arith.constant 0 : index
    %c0_3 = arith.constant 0 : index
    %c0_4 = arith.constant 0 : index
    %2 = vector.load %arg3[%c0_2, %c0_3, %c0_4] : memref<1x16x32xbf16, #tpu.memory_space<vmem>>, vector<1x16x32xbf16>
    %3 = vector.shape_cast %2 : vector<1x16x32xbf16> to vector<16x32xbf16>
    %c0_5 = arith.constant 0 : index
    %c0_6 = arith.constant 0 : index
    %4 = vector.load %arg4[%c0_5, %c0_6] : memref<32x32xbf16, #tpu.memory_space<vmem>>, vector<32x32xbf16>
    %cst = arith.constant dense<0.000000e+00> : vector<16x32xf32>
    %5 = tpu.matmul %1, %4, %cst {dimension_numbers = #tpu.dot_dimension_numbers<[1], [0], [0], [1], [0, 0, 1, 1], [], []>} : vector<16x32xbf16>, vector<32x32xbf16>, vector<16x32xf32> -> vector<16x32xf32>
    %cst_7 = arith.constant 0.353553385 : f32
    %6 = vector.broadcast %cst_7 : f32 to vector<16x32xf32>
    %7 = arith.mulf %5, %6 : vector<16x32xf32>
    %8 = arith.truncf %7 : vector<16x32xf32> to vector<16x32xbf16>
    %c0_8 = arith.constant 0 : index
    %c0_9 = arith.constant 0 : index
    %9 = vector.load %arg5[%c0_8, %c0_9] : memref<32x64xbf16, #tpu.memory_space<vmem>>, vector<32x64xbf16>
    %cst_10 = arith.constant dense<0.000000e+00> : vector<16x64xf32>
    %10 = tpu.matmul %3, %9, %cst_10 {dimension_numbers = #tpu.dot_dimension_numbers<[1], [0], [0], [1], [0, 0, 1, 1], [], []>} : vector<16x32xbf16>, vector<32x64xbf16>, vector<16x64xf32> -> vector<16x64xf32>
    %11 = arith.truncf %10 : vector<16x64xf32> to vector<16x64xbf16>
    %12 = vector.extract_strided_slice %11 {offsets = [0, 0], sizes = [16, 32], strides = [1, 1]} : vector<16x64xbf16> to vector<16x32xbf16>
    %13 = vector.extract_strided_slice %11 {offsets = [0, 32], sizes = [16, 32], strides = [1, 1]} : vector<16x64xbf16> to vector<16x32xbf16>
    %cst_11 = arith.constant 3.535160e-01 : bf16
    %14 = vector.broadcast %cst_11 : bf16 to vector<16x32xbf16>
    %15 = arith.mulf %13, %14 : vector<16x32xbf16>
    %16 = vector.extract_strided_slice %8 {offsets = [0, 0], sizes = [16, 8], strides = [1, 1]} : vector<16x32xbf16> to vector<16x8xbf16>
    %17 = vector.extract_strided_slice %12 {offsets = [0, 0], sizes = [16, 8], strides = [1, 1]} : vector<16x32xbf16> to vector<16x8xbf16>
    %18 = vector.extract_strided_slice %13 {offsets = [0, 0], sizes = [16, 8], strides = [1, 1]} : vector<16x32xbf16> to vector<16x8xbf16>
    %19 = vector.extract_strided_slice %15 {offsets = [0, 0], sizes = [16, 8], strides = [1, 1]} : vector<16x32xbf16> to vector<16x8xbf16>
    %cst_12 = arith.constant dense<0.000000e+00> : vector<16x16xf32>
    %20 = tpu.matmul %16, %17, %cst_12 {dimension_numbers = #tpu.dot_dimension_numbers<[1], [1], [0], [0], [0, 0, 1, 0], [], []>} : vector<16x8xbf16>, vector<16x8xbf16>, vector<16x16xf32> -> vector<16x16xf32>
    %cst_13 = arith.constant dense<0.000000e+00> : vector<16x16xf32>
    %21 = tpu.matmul %19, %18, %cst_13 {dimension_numbers = #tpu.dot_dimension_numbers<[1], [1], [0], [0], [0, 0, 1, 0], [], []>} : vector<16x8xbf16>, vector<16x8xbf16>, vector<16x16xf32> -> vector<16x16xf32>
    %cst_14 = arith.constant dense<0xFF800000> : vector<16xf32>
    %22 = vector.multi_reduction <maximumf>, %21, %cst_14 [1] : vector<16x16xf32> to vector<16xf32>
    %23 = vector.shape_cast %22 : vector<16xf32> to vector<16x1xf32>
    %24 = vector.broadcast %23 : vector<16x1xf32> to vector<16x16xf32>
    %25 = arith.subf %21, %24 : vector<16x16xf32>
    %26 = math.exp %25 : vector<16x16xf32>
    %27 = arith.truncf %26 : vector<16x16xf32> to vector<16x16xbf16>
    %28 = arith.extf %27 : vector<16x16xbf16> to vector<16x16xf32>
    %cst_15 = arith.constant dense<0.000000e+00> : vector<16xf32>
    %29 = vector.multi_reduction <add>, %28, %cst_15 [1] : vector<16x16xf32> to vector<16xf32>
    %30 = vector.shape_cast %29 : vector<16xf32> to vector<16x1xf32>
    %cst_16 = arith.constant dense<0.000000e+00> : vector<16x8xf32>
    %31 = tpu.matmul %27, %18, %cst_16 {dimension_numbers = #tpu.dot_dimension_numbers<[1], [0], [0], [1], [0, 0, 1, 1], [], []>} : vector<16x16xbf16>, vector<16x8xbf16>, vector<16x8xf32> -> vector<16x8xf32>
    %32 = tpu.reciprocal %30 {approx = true} : vector<16x1xf32> -> vector<16x1xf32>
    %33 = vector.broadcast %32 : vector<16x1xf32> to vector<16x8xf32>
    %34 = arith.mulf %31, %33 : vector<16x8xf32>
    %35 = arith.truncf %34 : vector<16x8xf32> to vector<16x8xbf16>
    %c0_17 = arith.constant 0 : index
    %c0_18 = arith.constant 0 : index
    %36 = vector.load %arg10[%c0_17, %c0_18] : memref<32x32xbf16, #tpu.memory_space<vmem>>, vector<16x8xbf16>
    tpu.vector_store %arg10[%c0_17, %c0_18], %35 {strides = array<i32>} : memref<32x32xbf16, #tpu.memory_space<vmem>>, vector<16x8xbf16>,
    %cst_19 = arith.constant dense<0xFF800000> : vector<16xf32>
    %37 = vector.multi_reduction <maximumf>, %20, %cst_19 [1] : vector<16x16xf32> to vector<16xf32>
    %38 = vector.shape_cast %37 : vector<16xf32> to vector<16x1xf32>
    %39 = vector.broadcast %38 : vector<16x1xf32> to vector<16x16xf32>
    %40 = arith.subf %20, %39 : vector<16x16xf32>
    %41 = math.exp %40 : vector<16x16xf32>
    %42 = arith.truncf %41 : vector<16x16xf32> to vector<16x16xbf16>
    %43 = arith.extf %42 : vector<16x16xbf16> to vector<16x16xf32>
    %cst_20 = arith.constant dense<0.000000e+00> : vector<16xf32>
    %44 = vector.multi_reduction <add>, %43, %cst_20 [1] : vector<16x16xf32> to vector<16xf32>
    %45 = vector.shape_cast %44 : vector<16xf32> to vector<16x1xf32>
    %cst_21 = arith.constant dense<0.000000e+00> : vector<16x8xf32>
    %46 = tpu.matmul %42, %18, %cst_21 {dimension_numbers = #tpu.dot_dimension_numbers<[1], [0], [0], [1], [0, 0, 1, 1], [], []>} : vector<16x16xbf16>, vector<16x8xbf16>, vector<16x8xf32> -> vector<16x8xf32>
    %47 = tpu.reciprocal %45 {approx = true} : vector<16x1xf32> -> vector<16x1xf32>
    %48 = vector.broadcast %47 : vector<16x1xf32> to vector<16x8xf32>
    %49 = arith.mulf %46, %48 : vector<16x8xf32>
    %50 = arith.truncf %49 : vector<16x8xf32> to vector<16x8xbf16>
    %c16 = arith.constant 16 : index
    %c0_22 = arith.constant 0 : index
    %51 = vector.load %arg10[%c16, %c0_22] : memref<32x32xbf16, #tpu.memory_space<vmem>>, vector<16x8xbf16>
    tpu.vector_store %arg10[%c16, %c0_22], %50 {strides = array<i32>} : memref<32x32xbf16, #tpu.memory_space<vmem>>, vector<16x8xbf16>,
    %52 = vector.extract_strided_slice %8 {offsets = [0, 8], sizes = [16, 8], strides = [1, 1]} : vector<16x32xbf16> to vector<16x8xbf16>
    %53 = vector.extract_strided_slice %12 {offsets = [0, 8], sizes = [16, 8], strides = [1, 1]} : vector<16x32xbf16> to vector<16x8xbf16>
    %54 = vector.extract_strided_slice %13 {offsets = [0, 8], sizes = [16, 8], strides = [1, 1]} : vector<16x32xbf16> to vector<16x8xbf16>
    %55 = vector.extract_strided_slice %15 {offsets = [0, 8], sizes = [16, 8], strides = [1, 1]} : vector<16x32xbf16> to vector<16x8xbf16>
    %cst_23 = arith.constant dense<0.000000e+00> : vector<16x16xf32>
    %56 = tpu.matmul %52, %53, %cst_23 {dimension_numbers = #tpu.dot_dimension_numbers<[1], [1], [0], [0], [0, 0, 1, 0], [], []>} : vector<16x8xbf16>, vector<16x8xbf16>, vector<16x16xf32> -> vector<16x16xf32>
    %cst_24 = arith.constant dense<0.000000e+00> : vector<16x16xf32>
    %57 = tpu.matmul %55, %54, %cst_24 {dimension_numbers = #tpu.dot_dimension_numbers<[1], [1], [0], [0], [0, 0, 1, 0], [], []>} : vector<16x8xbf16>, vector<16x8xbf16>, vector<16x16xf32> -> vector<16x16xf32>
    %cst_25 = arith.constant dense<0xFF800000> : vector<16xf32>
    %58 = vector.multi_reduction <maximumf>, %57, %cst_25 [1] : vector<16x16xf32> to vector<16xf32>
    %59 = vector.shape_cast %58 : vector<16xf32> to vector<16x1xf32>
    %60 = vector.broadcast %59 : vector<16x1xf32> to vector<16x16xf32>
    %61 = arith.subf %57, %60 : vector<16x16xf32>
    %62 = math.exp %61 : vector<16x16xf32>
    %63 = arith.truncf %62 : vector<16x16xf32> to vector<16x16xbf16>
    %64 = arith.extf %63 : vector<16x16xbf16> to vector<16x16xf32>
    %cst_26 = arith.constant dense<0.000000e+00> : vector<16xf32>
    %65 = vector.multi_reduction <add>, %64, %cst_26 [1] : vector<16x16xf32> to vector<16xf32>
    %66 = vector.shape_cast %65 : vector<16xf32> to vector<16x1xf32>
    %cst_27 = arith.constant dense<0.000000e+00> : vector<16x8xf32>
    %67 = tpu.matmul %63, %54, %cst_27 {dimension_numbers = #tpu.dot_dimension_numbers<[1], [0], [0], [1], [0, 0, 1, 1], [], []>} : vector<16x16xbf16>, vector<16x8xbf16>, vector<16x8xf32> -> vector<16x8xf32>
    %68 = tpu.reciprocal %66 {approx = true} : vector<16x1xf32> -> vector<16x1xf32>
    %69 = vector.broadcast %68 : vector<16x1xf32> to vector<16x8xf32>
    %70 = arith.mulf %67, %69 : vector<16x8xf32>
    %71 = arith.truncf %70 : vector<16x8xf32> to vector<16x8xbf16>
    %c0_28 = arith.constant 0 : index
    %c8 = arith.constant 8 : index
    %72 = vector.load %arg10[%c0_28, %c8] : memref<32x32xbf16, #tpu.memory_space<vmem>>, vector<16x8xbf16>
    tpu.vector_store %arg10[%c0_28, %c8], %71 {strides = array<i32>} : memref<32x32xbf16, #tpu.memory_space<vmem>>, vector<16x8xbf16>,
    %cst_29 = arith.constant dense<0xFF800000> : vector<16xf32>
    %73 = vector.multi_reduction <maximumf>, %56, %cst_29 [1] : vector<16x16xf32> to vector<16xf32>
    %74 = vector.shape_cast %73 : vector<16xf32> to vector<16x1xf32>
    %75 = vector.broadcast %74 : vector<16x1xf32> to vector<16x16xf32>
    %76 = arith.subf %56, %75 : vector<16x16xf32>
    %77 = math.exp %76 : vector<16x16xf32>
    %78 = arith.truncf %77 : vector<16x16xf32> to vector<16x16xbf16>
    %79 = arith.extf %78 : vector<16x16xbf16> to vector<16x16xf32>
    %cst_30 = arith.constant dense<0.000000e+00> : vector<16xf32>
    %80 = vector.multi_reduction <add>, %79, %cst_30 [1] : vector<16x16xf32> to vector<16xf32>
    %81 = vector.shape_cast %80 : vector<16xf32> to vector<16x1xf32>
    %cst_31 = arith.constant dense<0.000000e+00> : vector<16x8xf32>
    %82 = tpu.matmul %78, %54, %cst_31 {dimension_numbers = #tpu.dot_dimension_numbers<[1], [0], [0], [1], [0, 0, 1, 1], [], []>} : vector<16x16xbf16>, vector<16x8xbf16>, vector<16x8xf32> -> vector<16x8xf32>
    %83 = tpu.reciprocal %81 {approx = true} : vector<16x1xf32> -> vector<16x1xf32>
    %84 = vector.broadcast %83 : vector<16x1xf32> to vector<16x8xf32>
    %85 = arith.mulf %82, %84 : vector<16x8xf32>
    %86 = arith.truncf %85 : vector<16x8xf32> to vector<16x8xbf16>
    %c16_32 = arith.constant 16 : index
    %c8_33 = arith.constant 8 : index
    %87 = vector.load %arg10[%c16_32, %c8_33] : memref<32x32xbf16, #tpu.memory_space<vmem>>, vector<16x8xbf16>
    tpu.vector_store %arg10[%c16_32, %c8_33], %86 {strides = array<i32>} : memref<32x32xbf16, #tpu.memory_space<vmem>>, vector<16x8xbf16>,
    %88 = vector.extract_strided_slice %8 {offsets = [0, 16], sizes = [16, 8], strides = [1, 1]} : vector<16x32xbf16> to vector<16x8xbf16>
    %89 = vector.extract_strided_slice %12 {offsets = [0, 16], sizes = [16, 8], strides = [1, 1]} : vector<16x32xbf16> to vector<16x8xbf16>
    %90 = vector.extract_strided_slice %13 {offsets = [0, 16], sizes = [16, 8], strides = [1, 1]} : vector<16x32xbf16> to vector<16x8xbf16>
    %91 = vector.extract_strided_slice %15 {offsets = [0, 16], sizes = [16, 8], strides = [1, 1]} : vector<16x32xbf16> to vector<16x8xbf16>
    %cst_34 = arith.constant dense<0.000000e+00> : vector<16x16xf32>
    %92 = tpu.matmul %88, %89, %cst_34 {dimension_numbers = #tpu.dot_dimension_numbers<[1], [1], [0], [0], [0, 0, 1, 0], [], []>} : vector<16x8xbf16>, vector<16x8xbf16>, vector<16x16xf32> -> vector<16x16xf32>
    %cst_35 = arith.constant dense<0.000000e+00> : vector<16x16xf32>
    %93 = tpu.matmul %91, %90, %cst_35 {dimension_numbers = #tpu.dot_dimension_numbers<[1], [1], [0], [0], [0, 0, 1, 0], [], []>} : vector<16x8xbf16>, vector<16x8xbf16>, vector<16x16xf32> -> vector<16x16xf32>
    %cst_36 = arith.constant dense<0xFF800000> : vector<16xf32>
    %94 = vector.multi_reduction <maximumf>, %93, %cst_36 [1] : vector<16x16xf32> to vector<16xf32>
    %95 = vector.shape_cast %94 : vector<16xf32> to vector<16x1xf32>
    %96 = vector.broadcast %95 : vector<16x1xf32> to vector<16x16xf32>
    %97 = arith.subf %93, %96 : vector<16x16xf32>
    %98 = math.exp %97 : vector<16x16xf32>
    %99 = arith.truncf %98 : vector<16x16xf32> to vector<16x16xbf16>
    %100 = arith.extf %99 : vector<16x16xbf16> to vector<16x16xf32>
    %cst_37 = arith.constant dense<0.000000e+00> : vector<16xf32>
    %101 = vector.multi_reduction <add>, %100, %cst_37 [1] : vector<16x16xf32> to vector<16xf32>
    %102 = vector.shape_cast %101 : vector<16xf32> to vector<16x1xf32>
    %cst_38 = arith.constant dense<0.000000e+00> : vector<16x8xf32>
    %103 = tpu.matmul %99, %90, %cst_38 {dimension_numbers = #tpu.dot_dimension_numbers<[1], [0], [0], [1], [0, 0, 1, 1], [], []>} : vector<16x16xbf16>, vector<16x8xbf16>, vector<16x8xf32> -> vector<16x8xf32>
    %104 = tpu.reciprocal %102 {approx = true} : vector<16x1xf32> -> vector<16x1xf32>
    %105 = vector.broadcast %104 : vector<16x1xf32> to vector<16x8xf32>
    %106 = arith.mulf %103, %105 : vector<16x8xf32>
    %107 = arith.truncf %106 : vector<16x8xf32> to vector<16x8xbf16>
    %c0_39 = arith.constant 0 : index
    %c16_40 = arith.constant 16 : index
    %108 = vector.load %arg10[%c0_39, %c16_40] : memref<32x32xbf16, #tpu.memory_space<vmem>>, vector<16x8xbf16>
    tpu.vector_store %arg10[%c0_39, %c16_40], %107 {strides = array<i32>} : memref<32x32xbf16, #tpu.memory_space<vmem>>, vector<16x8xbf16>,
    %cst_41 = arith.constant dense<0xFF800000> : vector<16xf32>
    %109 = vector.multi_reduction <maximumf>, %92, %cst_41 [1] : vector<16x16xf32> to vector<16xf32>
    %110 = vector.shape_cast %109 : vector<16xf32> to vector<16x1xf32>
    %111 = vector.broadcast %110 : vector<16x1xf32> to vector<16x16xf32>
    %112 = arith.subf %92, %111 : vector<16x16xf32>
    %113 = math.exp %112 : vector<16x16xf32>
    %114 = arith.truncf %113 : vector<16x16xf32> to vector<16x16xbf16>
    %115 = arith.extf %114 : vector<16x16xbf16> to vector<16x16xf32>
    %cst_42 = arith.constant dense<0.000000e+00> : vector<16xf32>
    %116 = vector.multi_reduction <add>, %115, %cst_42 [1] : vector<16x16xf32> to vector<16xf32>
    %117 = vector.shape_cast %116 : vector<16xf32> to vector<16x1xf32>
    %cst_43 = arith.constant dense<0.000000e+00> : vector<16x8xf32>
    %118 = tpu.matmul %114, %90, %cst_43 {dimension_numbers = #tpu.dot_dimension_numbers<[1], [0], [0], [1], [0, 0, 1, 1], [], []>} : vector<16x16xbf16>, vector<16x8xbf16>, vector<16x8xf32> -> vector<16x8xf32>
    %119 = tpu.reciprocal %117 {approx = true} : vector<16x1xf32> -> vector<16x1xf32>
    %120 = vector.broadcast %119 : vector<16x1xf32> to vector<16x8xf32>
    %121 = arith.mulf %118, %120 : vector<16x8xf32>
    %122 = arith.truncf %121 : vector<16x8xf32> to vector<16x8xbf16>
    %c16_44 = arith.constant 16 : index
    %c16_45 = arith.constant 16 : index
    %123 = vector.load %arg10[%c16_44, %c16_45] : memref<32x32xbf16, #tpu.memory_space<vmem>>, vector<16x8xbf16>
    tpu.vector_store %arg10[%c16_44, %c16_45], %122 {strides = array<i32>} : memref<32x32xbf16, #tpu.memory_space<vmem>>, vector<16x8xbf16>,
    %124 = vector.extract_strided_slice %8 {offsets = [0, 24], sizes = [16, 8], strides = [1, 1]} : vector<16x32xbf16> to vector<16x8xbf16>
    %125 = vector.extract_strided_slice %12 {offsets = [0, 24], sizes = [16, 8], strides = [1, 1]} : vector<16x32xbf16> to vector<16x8xbf16>
    %126 = vector.extract_strided_slice %13 {offsets = [0, 24], sizes = [16, 8], strides = [1, 1]} : vector<16x32xbf16> to vector<16x8xbf16>
    %127 = vector.extract_strided_slice %15 {offsets = [0, 24], sizes = [16, 8], strides = [1, 1]} : vector<16x32xbf16> to vector<16x8xbf16>
    %cst_46 = arith.constant dense<0.000000e+00> : vector<16x16xf32>
    %128 = tpu.matmul %124, %125, %cst_46 {dimension_numbers = #tpu.dot_dimension_numbers<[1], [1], [0], [0], [0, 0, 1, 0], [], []>} : vector<16x8xbf16>, vector<16x8xbf16>, vector<16x16xf32> -> vector<16x16xf32>
    %cst_47 = arith.constant dense<0.000000e+00> : vector<16x16xf32>
    %129 = tpu.matmul %127, %126, %cst_47 {dimension_numbers = #tpu.dot_dimension_numbers<[1], [1], [0], [0], [0, 0, 1, 0], [], []>} : vector<16x8xbf16>, vector<16x8xbf16>, vector<16x16xf32> -> vector<16x16xf32>
    %cst_48 = arith.constant dense<0xFF800000> : vector<16xf32>
    %130 = vector.multi_reduction <maximumf>, %129, %cst_48 [1] : vector<16x16xf32> to vector<16xf32>
    %131 = vector.shape_cast %130 : vector<16xf32> to vector<16x1xf32>
    %132 = vector.broadcast %131 : vector<16x1xf32> to vector<16x16xf32>
    %133 = arith.subf %129, %132 : vector<16x16xf32>
    %134 = math.exp %133 : vector<16x16xf32>
    %135 = arith.truncf %134 : vector<16x16xf32> to vector<16x16xbf16>
    %136 = arith.extf %135 : vector<16x16xbf16> to vector<16x16xf32>
    %cst_49 = arith.constant dense<0.000000e+00> : vector<16xf32>
    %137 = vector.multi_reduction <add>, %136, %cst_49 [1] : vector<16x16xf32> to vector<16xf32>
    %138 = vector.shape_cast %137 : vector<16xf32> to vector<16x1xf32>
    %cst_50 = arith.constant dense<0.000000e+00> : vector<16x8xf32>
    %139 = tpu.matmul %135, %126, %cst_50 {dimension_numbers = #tpu.dot_dimension_numbers<[1], [0], [0], [1], [0, 0, 1, 1], [], []>} : vector<16x16xbf16>, vector<16x8xbf16>, vector<16x8xf32> -> vector<16x8xf32>
    %140 = tpu.reciprocal %138 {approx = true} : vector<16x1xf32> -> vector<16x1xf32>
    %141 = vector.broadcast %140 : vector<16x1xf32> to vector<16x8xf32>
    %142 = arith.mulf %139, %141 : vector<16x8xf32>
    %143 = arith.truncf %142 : vector<16x8xf32> to vector<16x8xbf16>
    %c0_51 = arith.constant 0 : index
    %c24 = arith.constant 24 : index
    %144 = vector.load %arg10[%c0_51, %c24] : memref<32x32xbf16, #tpu.memory_space<vmem>>, vector<16x8xbf16>
    tpu.vector_store %arg10[%c0_51, %c24], %143 {strides = array<i32>} : memref<32x32xbf16, #tpu.memory_space<vmem>>, vector<16x8xbf16>,
    %cst_52 = arith.constant dense<0xFF800000> : vector<16xf32>
    %145 = vector.multi_reduction <maximumf>, %128, %cst_52 [1] : vector<16x16xf32> to vector<16xf32>
    %146 = vector.shape_cast %145 : vector<16xf32> to vector<16x1xf32>
    %147 = vector.broadcast %146 : vector<16x1xf32> to vector<16x16xf32>
    %148 = arith.subf %128, %147 : vector<16x16xf32>
    %149 = math.exp %148 : vector<16x16xf32>
    %150 = arith.truncf %149 : vector<16x16xf32> to vector<16x16xbf16>
    %151 = arith.extf %150 : vector<16x16xbf16> to vector<16x16xf32>
    %cst_53 = arith.constant dense<0.000000e+00> : vector<16xf32>
    %152 = vector.multi_reduction <add>, %151, %cst_53 [1] : vector<16x16xf32> to vector<16xf32>
    %153 = vector.shape_cast %152 : vector<16xf32> to vector<16x1xf32>
    %cst_54 = arith.constant dense<0.000000e+00> : vector<16x8xf32>
    %154 = tpu.matmul %150, %126, %cst_54 {dimension_numbers = #tpu.dot_dimension_numbers<[1], [0], [0], [1], [0, 0, 1, 1], [], []>} : vector<16x16xbf16>, vector<16x8xbf16>, vector<16x8xf32> -> vector<16x8xf32>
    %155 = tpu.reciprocal %153 {approx = true} : vector<16x1xf32> -> vector<16x1xf32>
    %156 = vector.broadcast %155 : vector<16x1xf32> to vector<16x8xf32>
    %157 = arith.mulf %154, %156 : vector<16x8xf32>
    %158 = arith.truncf %157 : vector<16x8xf32> to vector<16x8xbf16>
    %c16_55 = arith.constant 16 : index
    %c24_56 = arith.constant 24 : index
    %159 = vector.load %arg10[%c16_55, %c24_56] : memref<32x32xbf16, #tpu.memory_space<vmem>>, vector<16x8xbf16>
    tpu.vector_store %arg10[%c16_55, %c24_56], %158 {strides = array<i32>} : memref<32x32xbf16, #tpu.memory_space<vmem>>, vector<16x8xbf16>,
    %c0_57 = arith.constant 0 : index
    %c0_58 = arith.constant 0 : index
    %160 = vector.load %arg10[%c0_57, %c0_58] : memref<32x32xbf16, #tpu.memory_space<vmem>>, vector<32x32xbf16>
    %c0_59 = arith.constant 0 : index
    %c0_60 = arith.constant 0 : index
    %161 = vector.load %arg6[%c0_59, %c0_60] : memref<32x32xbf16, #tpu.memory_space<vmem>>, vector<32x32xbf16>
    %cst_61 = arith.constant dense<0.000000e+00> : vector<32x32xf32>
    %162 = tpu.matmul %160, %161, %cst_61 {dimension_numbers = #tpu.dot_dimension_numbers<[1], [0], [0], [1], [0, 0, 1, 1], [], []>} : vector<32x32xbf16>, vector<32x32xbf16>, vector<32x32xf32> -> vector<32x32xf32>
    %c0_62 = arith.constant 0 : index
    %c0_63 = arith.constant 0 : index
    %163 = vector.load %arg7[%c0_62, %c0_63] : memref<1x32xf32, #tpu.memory_space<vmem>>, vector<1x32xf32>
    %164 = vector.broadcast %163 : vector<1x32xf32> to vector<32x32xf32>
    %165 = arith.addf %162, %164 : vector<32x32xf32>
    %166 = vector.extract_strided_slice %165 {offsets = [0, 0], sizes = [16, 32], strides = [1, 1]} : vector<32x32xf32> to vector<16x32xf32>
    %c0_64 = arith.constant 0 : index
    %c0_65 = arith.constant 0 : index
    %c0_66 = arith.constant 0 : index
    %167 = vector.load %arg8[%c0_64, %c0_65, %c0_66] : memref<1x16x32xf32, #tpu.memory_space<vmem>>, vector<1x16x32xf32>
    %168 = vector.shape_cast %167 : vector<1x16x32xf32> to vector<16x32xf32>
    %169 = vector.shape_cast %166 : vector<16x32xf32> to vector<1x16x32xf32>
    tpu.vector_store %arg8[%c0_64, %c0_65, %c0_66], %169 {strides = array<i32>} : memref<1x16x32xf32, #tpu.memory_space<vmem>>, vector<1x16x32xf32>,
    %170 = vector.extract_strided_slice %165 {offsets = [16, 0], sizes = [16, 32], strides = [1, 1]} : vector<32x32xf32> to vector<16x32xf32>
    %c0_67 = arith.constant 0 : index
    %c0_68 = arith.constant 0 : index
    %c0_69 = arith.constant 0 : index
    %171 = vector.load %arg9[%c0_67, %c0_68, %c0_69] : memref<1x16x32xf32, #tpu.memory_space<vmem>>, vector<1x16x32xf32>
    %172 = vector.shape_cast %171 : vector<1x16x32xf32> to vector<16x32xf32>
    %173 = vector.shape_cast %170 : vector<16x32xf32> to vector<1x16x32xf32>
    tpu.vector_store %arg9[%c0_67, %c0_68, %c0_69], %173 {strides = array<i32>} : memref<1x16x32xf32, #tpu.memory_space<vmem>>, vector<1x16x32xf32>,
    return
  }
  func.func @transform_0(%arg0: i32, %arg1: i32) -> (i32, i32, i32) {
    %c0_i32 = arith.constant 0 : i32
    %c0_i32_0 = arith.constant 0 : i32
    return %arg0, %arg1, %c0_i32 : i32, i32, i32
  }
  func.func @transform_1(%arg0: i32, %arg1: i32) -> (i32, i32, i32) {
    %c0_i32 = arith.constant 0 : i32
    %c0_i32_0 = arith.constant 0 : i32
    %c0_i32_1 = arith.constant 0 : i32
    return %arg0, %c0_i32, %c0_i32_0 : i32, i32, i32
  }
  func.func @transform_2(%arg0: i32, %arg1: i32) -> (i32, i32) {
    %c0_i32 = arith.constant 0 : i32
    %c0_i32_0 = arith.constant 0 : i32
    %c0_i32_1 = arith.constant 0 : i32
    return %c0_i32, %c0_i32_0 : i32, i32
  }
  func.func @transform_3(%arg0: i32, %arg1: i32) -> (i32, i32) {
    %c0_i32 = arith.constant 0 : i32
    %c0_i32_0 = arith.constant 0 : i32
    %c0_i32_1 = arith.constant 0 : i32
    return %c0_i32, %c0_i32_0 : i32, i32
  }
  func.func @transform_4(%arg0: i32, %arg1: i32) -> (i32, i32) {
    %c0_i32 = arith.constant 0 : i32
    %c0_i32_0 = arith.constant 0 : i32
    %c0_i32_1 = arith.constant 0 : i32
    return %c0_i32, %c0_i32_0 : i32, i32
  }
  func.func @transform_5(%arg0: i32, %arg1: i32) -> (i32, i32) {
    %c0_i32 = arith.constant 0 : i32
    %c0_i32_0 = arith.constant 0 : i32
    %c0_i32_1 = arith.constant 0 : i32
    return %c0_i32, %c0_i32_0 : i32, i32
  }
  func.func @transform_6(%arg0: i32, %arg1: i32) -> (i32, i32, i32) {
    %c0_i32 = arith.constant 0 : i32
    %c0_i32_0 = arith.constant 0 : i32
    return %arg0, %arg1, %c0_i32 : i32, i32, i32
  }
  func.func @transform_7(%arg0: i32, %arg1: i32) -> (i32, i32, i32) {
    %c0_i32 = arith.constant 0 : i32
    %c0_i32_0 = arith.constant 0 : i32
    return %arg0, %arg1, %c0_i32 : i32, i32, i32
  }
}

</mosaic_0001>

<bundles_post_ra>
// kernel: attention_forward.1
= control target key start
LH: loop header
LB: loop body
LE: loop exit
PB: predicated region body
PF: predicated region fallthrough
CT: control target
= control target key end

     0   :  { %s1999_s0 = inlined_call_operand.vmem [shape: bf16[2,16,32], index: 0, kind: input, shape index: {}, may-alias: {0,1}]   ;;  %s2000_s1 = inlined_call_operand.vmem [shape: bf16[2,16,32], index: 1, kind: input, shape index: {}, may-alias: {0,1}]   ;;  %s2001_s2 = inlined_call_operand.vmem [shape: bf16[32,32], index: 2, kind: input, shape index: {}]   ;;  %s2002_s3 = inlined_call_operand.vmem [shape: bf16[32,64], index: 3, kind: input, shape index: {}]   ;;  %s2003_s4 = inlined_call_operand.vmem [shape: bf16[32,32], index: 4, kind: input, shape index: {}]   ;;  %s2004_s5 = inlined_call_operand.vmem [shape: f32[1,32], index: 5, kind: input, shape index: {}]   ;;  %s2005_s6 = inlined_call_operand.hbm [shape: f32[2,16,32], index: 6, kind: output, shape index: {0}]   ;;  %s2006_s7 = inlined_call_operand.hbm [shape: f32[2,16,32], index: 7, kind: output, shape index: {1}]  }
   0x1   :  { %2011 = sst [smem:[#allocation9_spill]] %s1999_s0 }
   0x2   :  { %13 = vsyncpa [#allocation4], 0 }
   0x3   :  { %15 = vsyncpa [#allocation4 + $0x1], 0 }
   0x4   :  { %16 = vsyncpa [#allocation6], 0 }
   0x5   :  { %18 = vsyncpa [#allocation6 + $0x1], 0  ;;  %s1689_s24 = smov 0   ;;  %s1691_s25 = smov 0  }
   0x6   :  { %s1693_s26 = smov 0   ;;  %s1695_s27 = smov 0  }
   0x7   :  { %s1697_s28 = smov 0   ;;  %s1699_s29 = smov 0  }
   0x8 LB: > { %s1297_s30 = sadd.s32 4294967295, %s1636_s29   ;;  %s1298_s8 = sadd.s32 4294967294, %s1636_s29   ;;  %s1636_s29 = sphi %s1699_s29, %s24_s29   ;;  %s1632_s28 = sphi %s1697_s28, %s2022_s28   ;;  %s1628_s27 = sphi %s1695_s27, %s2021_s27   ;;  %s1624_s26 = sphi %s1693_s26, %s2020_s26   ;;  %s1620_s25 = sphi %s1691_s25, %s2019_s25   ;;  %s1616_s24 = sphi %s1689_s24, %s2018_s24  }
   0x9   : > { %s36_s9 = sadd.s32 1, %s1632_s28  ;;  %s183_s10 = sadd.s32 1, %s1624_s26 }
   0xa   : > { %p38_p0 = scmp.ge.s32.totalorder %s36_s9, 2  ;;  %p193_p1 = scmp.ne.s32.totalorder %s1624_s26, %s1620_s25 }
   0xb   : > { %p194_p2 = scmp.eq.s32.totalorder %s1297_s30, 1  ;;  %p199_p3 = scmp.ne.s32.totalorder %s1620_s25, %s1616_s24 }
   0xc   : > { %s2024_s9 = smov (%p38_p0, %s36_s9), 0  ;;  %p200_p5 = scmp.eq.s32.totalorder %s1298_s8, 1 }
   0xd   : > { %p1729_p4 = por %p194_p2, %p193_p1  ;;  %s178_s12 = ssub.s32 %s1632_s28, %s2024_s9 }
   0xe   : > { %p1301_p6 = scmp.ge.s32.totalorder %s1636_s29, 1  ;;  %p181_p7 = scmp.eq.s32.totalorder %s178_s12, 0 }
   0xf   : > { %p1736_p8 = por %p200_p5, %p199_p3  ;;  %p279_p9 = scmp.lt.s32.totalorder %s1636_s29, 3 }
  0x10   : > { %s1742_s14 = scalar_select %p181_p7, %s1624_s26, %s183_s10  }
  0x11   : > { %p280_p10 = pnand %p1301_p6, %p279_p9 }
  0x12   : > { %p326_p11 = scmp.lt.s32.totalorder (!%p280_p10), %s1628_s27, 1  ;;  %s2014_s0 = sld [smem:[#allocation9_spill]] (!%p280_p10) }
  0x13   : > { %283 = sbr.rel (%p280_p10) target bundleno = 1079 (0x437), region = 44  ;;  %s1638_s18 = smov (!%p280_p10), 120  }
  0x14   : > { %s1639_s19 = smov (!%p280_p10), 88   ;;  %s1640_s20 = smov (!%p280_p10), 96  }
  0x15   : > { %s1642_s22 = smov (!%p280_p10), 112   ;;  %s1643_s23 = smov (!%p280_p10), 72  }
  0x16   : > { %s2008_s8 = smov (!%p280_p10), 8   ;;  %s1646_s10 = smov (!%p280_p10), 16  }
  0x18   : > { %v1383_v0 = vld [vmem:[%s2002_s3 + $0x8] sm:$0xff]  ;;  %v1382_v2 = vld [vmem:[%s2002_s3] sm:$0xff]  ;;  %s327_s21 = scalar_select %p326_p11, %s1628_s27, 1  ;;  %vm368_vm0 = vcmask 261120   ;;  %vm446_vm1 = vcmask 64512   ;;  %vm496_vm2 = vcmask 130048  }
  0x19   : > { %v1381_v1 = vld [vmem:[%s2001_s2 + $0x8] sm:$0xff]  ;;  %420 = vmatpush.bf16.msra.mxu1 %v1383_v0  ;;  %v1380_v3 = vld [vmem:[%s2001_s2] sm:$0xff]  ;;  %vm542_vm3 = vcmask 60416   ;;  %vm692_vm4 = vcmask 126016   ;;  %vm850_vm5 = vcmask 191616   ;;  %vm1008_vm6 = vcmask 257216  }
  0x1a   : > { %378 = vmatpush.bf16.msra.mxu0 %v1381_v1  ;;  %s1376_s30 = sshll.u32 %s327_s21, 3  ;;  %s1641_s21 = smov 80  }
  0x1b   : > { %s339_s12 = scalar_lea.vmem %s2000_s1, %s1376_s30  ;;  %s333_s17 = scalar_lea.vmem %s2014_s0, %s1376_s30 }
  0x1c   : > { %v1379_v4 = vld [vmem:[%s339_s12] sm:$0xff]  ;;  %s1644_s30 = smov 104   ;;  %s1647_s12 = smov 24  }
  0x1d   : > { %421 = vmatpush.bf16.msra.mxu1 %v1382_v2  ;;  %v1378_v5 = vld [vmem:[%s333_s17] sm:$0xff] }
  0x1e   : > { %379 = vmatpush.bf16.msra.mxu0 %v1380_v3 }
  0x20   : > { %1333 = vmatmul.msk.bf16.vlgmr.msra.gmra.mxu1 %vm368_vm0, %v1379_v4 }
  0x21   : > { %1320 = vmatmul.msk.bf16.vlgmr.msra.gmra.mxu0 %vm368_vm0, %v1378_v5 }
  0x9d   : > { %v423_v6 = vpop.f32.mrf.mxu1 }
  0x9e   : > { %v381_v7 = vpop.f32.mrf.mxu0  ;;  %v428_v8 = vpack.c.bf16 %v423_v6, %v423_v6 }
  0x9f   : > { %v386_v10 = vmul.f32 0.35355338, %v381_v7 }
  0xa0   : > { %v430_v9 = vunpack.c.l.bf16 %v428_v8  ;;  %v443_v16 = vunpack.c.l.b16 %v428_v8 }
  0xa1   : > { %v388_v19 = vpack.c.bf16 %v386_v10, %v386_v10 }
  0xa2   : > { %v432_v15 = vmul.f32 0.35351563, %v430_v9 }
  0xa3   : > { %v438_v26 = vunpack.c.l.b16 %v388_v19 }
  0xa4   : > { %v434_v23 = vpack.c.bf16 %v432_v15, %v432_v15 }
  0xa5   : > { %v425_v11 = vpop.f32.mrf.mxu1 }
  0xa6   : > { %v383_v12 = vpop.f32.mrf.mxu0  ;;  %v429_v13 = vpack.c.bf16 %v425_v11, %v425_v11  ;;  %v469_v29 = vunpack.c.l.b16 %v434_v23 }
  0xa7   : > { %v387_v14 = vmul.f32 0.35355338, %v383_v12 }
  0xa8   : > { %v431_v17 = vunpack.c.l.bf16 %v429_v13  ;;  %v444_v18 = vunpack.c.l.b16 %v429_v13 }
  0xa9   : > { %v389_v20 = vpack.c.bf16 %v387_v14, %v387_v14 }
  0xaa   : > { %v433_v21 = vmul.f32 0.35351563, %v431_v17  ;;  %v445_v22 = vpack.c.b16 %v444_v18, %v443_v16 }
  0xab   : > { %v439_v27 = vunpack.c.l.b16 %v389_v20 }
  0xac   : > { %v435_v24 = vpack.c.bf16 %v433_v21, %v433_v21  ;;  %593 = vrot.lane.b32.xlu2 %v445_v22, %s1638_s18  ;;  %617 = vrot.lane.b32.xlu1 %v445_v22, %s1639_s19  ;;  %v451_v25 = vsel %vm446_vm1, %v445_v22, 0 }
  0xad   : > { %474 = vrot.lane.b32.xlu0 %v445_v22, %s1640_s20  ;;  %460 = vmatpush.bf16.xpose.msra.mxu3 %v451_v25  ;;  %v440_v30 = vpack.c.b16 %v439_v27, %v438_v26 }
  0xae   : > { %v470_v28 = vunpack.c.l.b16 %v435_v24 }
  0xb0   : > { %v471_v31 = vpack.c.b16 %v470_v28, %v469_v29 }
  0xb4   : > { %775 = vrot.lane.b32.xlu2 %v445_v22, %s1641_s21  ;;  %615 = vrot.lane.b32.xlu1 %v471_v31, %s1639_s19  ;;  %s1924_s19 = sand.u32 1, %s1620_s25  }
  0xb5   : > { %472 = vrot.lane.b32.xlu0 %v471_v31, %s1640_s20  ;;  %1334 = vmatmul.msk.bf16.vlgmr.msra.gmra.mxu3 %vm446_vm1, %v440_v30  ;;  %s2007_s20 = sshll.u32 %s1924_s19, 4 }
  0xbc   : > { %751 = vrot.lane.b32.xlu2 %v445_v22, %s1642_s22  ;;  %773 = vrot.lane.b32.xlu1 %v471_v31, %s1641_s21 }
  0xbd   : > { %591 = vrot.lane.b32.xlu0 %v440_v30, %s1638_s18  ;;  %s1129_s18 = scalar_lea.sflag [#allocation4], %s1924_s19 }
  0xc4   : > { %931 = vrot.lane.b32.xlu2 %v471_v31, %s1643_s23  ;;  %749 = vrot.lane.b32.xlu1 %v440_v30, %s1642_s22 }
  0xc5   : > { %933 = vrot.lane.b32.xlu0 %v445_v22, %s1643_s23  ;;  %s2010_s23 = sshll.u32 %s1628_s27, 4 }
  0xc6   : > { %s1147_s15 = scalar_lea.hbm %s2005_s6, %s2010_s23 }
  0xc7   : > { %s1150_s17 = sshll.u32 %s1147_s15, 4  ;;  %s1151_s17 = int_to_ptr.hbm [resolvable:$true] %s1150_s17 }
  0xc8   : > { %s1540_s21 = sshra.s32 %s1151_s17, 4  ;;  %s1541_s21 = int_to_ptr.hbm [resolvable:$true] %s1540_s21 }
  0xc9   : > { %s1542_s22 = scalar_lea.hbm %s1541_s21, 16  ;;  %p1547_p1 = scmp.lt.s32.totalorder %s1541_s21, %s2005_s6 }
  0xca   : > { %p1543_p12 = scmp.ne.s32.totalorder %s1541_s21, %s1542_s22 }
  0xcc   : > { %907 = vrot.lane.b32.xlu1 %v440_v30, %s1644_s30  ;;  %p1544_p13 = pnand %p1543_p12, %p1729_p4 }
  0xcd   : > { %909 = vrot.lane.b32.xlu0 %v445_v22, %s1644_s30  ;;  %s317_s30 = scalar_lea.vmem [#allocation3], %s2007_s20 }
  0xce   : > { %s1148_s16 = sshll.u32 %s317_s30, 4  ;;  %p1545_p0 = pneg %p1544_p13  ;;  %s1149_s16 = int_to_ptr.vmem [resolvable:$true] %s1148_s16 }
 0x106   : > { %v594_v32 = vpop.permute.xlu2 %593 }
 0x107   : > { %v599_v33 = vsel %vm446_vm1, %v594_v32, 0 }
 0x108   : > { %608 = vmatpush.bf16.xpose.msra.mxu2 %v599_v33 }
 0x10e   : > { %v1769_v34 = vpop.permute.xlu2 %775 }
 0x10f   : > { %v781_v42 = vsel %vm446_vm1, %v1769_v34, 0 }
 0x116   : > { %v752_v35 = vpop.permute.xlu2 %751 }
 0x117   : > { %v757_v36 = vsel %vm446_vm1, %v752_v35, 0 }
 0x118   : > { %766 = vmatpush.bf16.xpose.msrb.mxu2 %v757_v36 }
 0x11e   : > { %v618_v37 = vpop.permute.xlu1 %617  ;;  %v932_v54 = vpop.permute.xlu2 %931 }
 0x11f   : > { %v475_v38 = vpop.permute.xlu0 %474  ;;  %v623_v39 = vsel %vm446_vm1, %v618_v37, 0 }
 0x120   : > { %529 = vmatpush.bf16.msrb.mxu0 %v475_v38  ;;  %576 = vmatpush.bf16.msrb.mxu1 %v475_v38  ;;  %v480_v40 = vsel %vm446_vm1, %v475_v38, 0 }
 0x121   : > { %489 = vmatpush.bf16.xpose.msrb.mxu3 %v480_v40 }
 0x124   : > { %671 = vmatpush.bf16.msra.mxu0 %v618_v37  ;;  %726 = vmatpush.bf16.msra.mxu1 %v618_v37 }
 0x126   : > { %v616_v43 = vpop.permute.xlu1 %615 }
 0x127   : > { %v473_v41 = vpop.permute.xlu0 %472 }
 0x128   : > { %1335 = vmatmul.msk.bf16.vlgmr.msrb.gmra.mxu3 %vm446_vm1, %v473_v41 }
 0x129   : > { %632 = vmatpush.bf16.xpose.msra.mxu3 %v623_v39 }
 0x12e   : > { %v774_v45 = vpop.permute.xlu1 %773 }
 0x12f   : > { %v592_v44 = vpop.permute.xlu0 %591 }
 0x130   : > { %1338 = vmatmul.msk.bf16.vlgmr.msra.gmra.mxu2 %vm446_vm1, %v592_v44 }
 0x131   : > { %790 = vmatpush.bf16.xpose.msrb.mxu3 %v781_v42 }
 0x136   : > { %v750_v50 = vpop.permute.xlu1 %749 }
 0x137   : > { %v1778_v46 = vpop.permute.xlu0 %933 }
 0x138   : > { %v1780_v47 = vpop.f32.mrf.mxu3  ;;  %1339 = vmatmul.msk.bf16.vlgmr.msra.gmra.mxu3 %vm446_vm1, %v616_v43  ;;  %v939_v48 = vsel %vm446_vm1, %v1778_v46, 0 }
 0x139   : > { %948 = vmatpush.bf16.xpose.msra.mxu3 %v939_v48  ;;  %v545_v49 = vsel %vm496_vm2, %v1780_v47, -inf }
 0x13a   : > { %546 = vmax.xlane.f32.xlu1 %v545_v49 }
 0x13e   : > { %v908_v53 = vpop.permute.xlu1 %907 }
 0x13f   : > { %v910_v51 = vpop.permute.xlu0 %909 }
 0x140   : > { %v915_v52 = vsel %vm446_vm1, %v910_v51, 0  ;;  %1342 = vmatmul.msk.bf16.vlgmr.msrb.gmra.mxu2 %vm446_vm1, %v750_v50  ;;  %v464_v55 = vpop.f32.mrf.mxu3 }
 0x141   : > { %924 = vmatpush.bf16.xpose.msra.mxu2 %v915_v52  ;;  %v548_v61 = vsel %vm496_vm2, %v464_v55, -inf }
 0x148   : > { %1343 = vmatmul.msk.bf16.vlgmr.msrb.gmra.mxu3 %vm446_vm1, %v774_v45 }
 0x150   : > { %1346 = vmatmul.msk.bf16.vlgmr.msra.gmra.mxu2 %vm446_vm1, %v908_v53 }
 0x158   : > { %1347 = vmatmul.msk.bf16.vlgmr.msra.gmra.mxu3 %vm446_vm1, %v932_v54 }
 0x1ab   : > { %v491_v56 = vpop.f32.mrf.mxu3 }
 0x1ac   : > { %v497_v57 = vsel %vm496_vm2, %v491_v56, -inf }
 0x1ad   : > { %498 = vmax.xlane.f32.xlu2 %v497_v57  ;;  %v547_v22 = vpop.xlane.xlu1 %546 }
 0x1ae   : > { %v551_v23 = vsub.f32 %v1780_v47, %v547_v22 }
 0x1b0   : > { %v553_v25 = vmul.f32 1.442695, %v551_v23 }
 0x1b2   : > { %1462 = vpow2.f32 %v553_v25 }
 0x1b3   : > { %v493_v58 = vpop.f32.mrf.mxu3  ;;  %v1793_v59 = vpop.f32.mrf.mxu2 }
 0x1b4   : > { %v695_v60 = vsel %vm496_vm2, %v1793_v59, -inf  ;;  %v500_v62 = vsel %vm496_vm2, %v493_v58, -inf }
 0x1b5   : > { %696 = vmax.xlane.f32.xlu1 %v695_v60  ;;  %549 = vmax.xlane.f32.xlu2 %v548_v61 }
 0x1b6   : > { %501 = vmax.xlane.f32.xlu0 %v500_v62 }
 0x1b8   : > { %v1463_v36 = vpop.eup %1462 }
 0x1bb   : > { %v1799_v63 = vpop.f32.mrf.mxu2  ;;  %v634_v0 = vpop.f32.mrf.mxu3 }
 0x1bc   : > { %v639_v1 = vsel %vm496_vm2, %v634_v0, -inf  ;;  %v698_v4 = vsel %vm496_vm2, %v1799_v63, -inf }
 0x1bd   : > { %640 = vmax.xlane.f32.xlu2 %v639_v1 }
 0x1c3   : > { %v1802_v2 = vpop.f32.mrf.mxu3  ;;  %v1804_v3 = vpop.f32.mrf.mxu2 }
 0x1c4   : > { %v642_v5 = vsel %vm496_vm2, %v1802_v2, -inf  ;;  %v853_v7 = vsel %vm496_vm2, %v1804_v3, -inf }
 0x1c5   : > { %699 = vmax.xlane.f32.xlu2 %v698_v4  ;;  %643 = vmax.xlane.f32.xlu0 %v642_v5 }
 0x1cb   : > { %v1810_v6 = vpop.f32.mrf.mxu3  ;;  %v1816_v9 = vpop.f32.mrf.mxu2 }
 0x1cc   : > { %v797_v8 = vsel %vm496_vm2, %v1810_v6, -inf  ;;  %v856_v12 = vsel %vm496_vm2, %v1816_v9, -inf }
 0x1cd   : > { %854 = vmax.xlane.f32.xlu2 %v853_v7  ;;  %798 = vmax.xlane.f32.xlu0 %v797_v8 }
 0x1d3   : > { %v1818_v10 = vpop.f32.mrf.mxu3  ;;  %v1824_v13 = vpop.f32.mrf.mxu2 }
 0x1d4   : > { %v800_v11 = vsel %vm496_vm2, %v1818_v10, -inf  ;;  %v1011_v16 = vsel %vm496_vm2, %v1824_v13, -inf }
 0x1d5   : > { %801 = vmax.xlane.f32.xlu1 %v800_v11  ;;  %857 = vmax.xlane.f32.xlu0 %v856_v12 }
 0x1db   : > { %v1826_v14 = vpop.f32.mrf.mxu3  ;;  %v1832_v17 = vpop.f32.mrf.mxu2 }
 0x1dc   : > { %v955_v15 = vsel %vm496_vm2, %v1826_v14, -inf  ;;  %v1014_v20 = vsel %vm496_vm2, %v1832_v17, -inf }
 0x1dd   : > { %956 = vmax.xlane.f32.xlu1 %v955_v15  ;;  %1012 = vmax.xlane.f32.xlu0 %v1011_v16 }
 0x1e3   : > { %v1834_v18 = vpop.f32.mrf.mxu3 }
 0x1e4   : > { %v958_v19 = vsel %vm496_vm2, %v1834_v18, -inf }
 0x1e5   : > { %959 = vmax.xlane.f32.xlu2 %v958_v19  ;;  %1015 = vmax.xlane.f32.xlu1 %v1014_v20 }
 0x220   : > { %v499_v21 = vpop.xlane.xlu2 %498 }
 0x221   : > { %v503_v24 = vsub.f32 %v491_v56, %v499_v21 }
 0x223   : > { %v505_v27 = vmul.f32 1.442695, %v503_v24 }
 0x225   : > { %1464 = vpow2.f32 %v505_v27 }
 0x228   : > { %v550_v26 = vpop.xlane.xlu2 %549  ;;  %v697_v33 = vpop.xlane.xlu1 %696 }
 0x229   : > { %v552_v28 = vsub.f32 %v464_v55, %v550_v26  ;;  %v502_v29 = vpop.xlane.xlu0 %501  ;;  %v701_v38 = vsub.f32 %v1793_v59, %v697_v33 }
 0x22a   : > { %v504_v30 = vsub.f32 %v493_v58, %v502_v29 }
 0x22b   : > { %v555_v31 = vmul.f32 1.442695, %v552_v28  ;;  %v1465_v37 = vpop.eup %1464  ;;  %v703_v44 = vmul.f32 1.442695, %v701_v38 }
 0x22c   : > { %v507_v32 = vmul.f32 1.442695, %v504_v30 }
 0x22d   : > { %1466 = vpow2.f32 %v555_v31 }
 0x22e   : > { %1468 = vpow2.f32 %v507_v32 }
 0x22f   : > { %1470 = vpow2.f32 %v703_v44 }
 0x230   : > { %v641_v35 = vpop.xlane.xlu2 %640 }
 0x231   : > { %v645_v40 = vsub.f32 %v634_v0, %v641_v35 }
 0x233   : > { %v1467_v39 = vpop.eup %1466  ;;  %v647_v45 = vmul.f32 1.442695, %v645_v40 }
 0x234   : > { %v1469_v41 = vpop.eup %1468  ;;  %v1842_v42 = vpack.c.bf16 %v1467_v39, %v1463_v36 }
 0x235   : > { %v509_v43 = vpack.c.bf16 %v1469_v41, %v1465_v37  ;;  %1472 = vpow2.f32 %v647_v45  ;;  %v1471_v55 = vpop.eup %1470 }
 0x236   : > { %1337 = vmatmul.msk.bf16.vlgmr.msrb.gmra.mxu1 %vm496_vm2, %v1842_v42 }
 0x237   : > { %1336 = vmatmul.msk.bf16.vlgmr.msrb.gmra.mxu0 %vm496_vm2, %v509_v43  ;;  %884 = vmatpush.bf16.msrb.mxu1 %v1769_v34  ;;  %v510_v12 = vunpack.c.l.bf16 %v509_v43  ;;  %v511_v15 = vunpack.c.h.bf16 %v509_v43 }
 0x238   : > { %v700_v47 = vpop.xlane.xlu2 %699  ;;  %v644_v48 = vpop.xlane.xlu0 %643  ;;  %829 = vmatpush.bf16.msrb.mxu0 %v1769_v34 }
 0x239   : > { %v702_v49 = vsub.f32 %v1799_v63, %v700_v47  ;;  %v646_v50 = vsub.f32 %v1802_v2, %v644_v48  ;;  %v512_v19 = vsel %vm496_vm2, %v510_v12, 0.0 }
 0x23b   : > { %v705_v51 = vmul.f32 1.442695, %v702_v49  ;;  %v649_v52 = vmul.f32 1.442695, %v646_v50  ;;  %v1473_v56 = vpop.eup %1472 }
 0x23d   : > { %1474 = vpow2.f32 %v705_v51 }
 0x23e   : > { %1476 = vpow2.f32 %v649_v52 }
 0x240   : > { %v855_v53 = vpop.xlane.xlu2 %854  ;;  %v799_v54 = vpop.xlane.xlu0 %798 }
 0x241   : > { %v859_v58 = vsub.f32 %v1804_v3, %v855_v53  ;;  %v803_v34 = vsub.f32 %v1810_v6, %v799_v54 }
 0x243   : > { %v1475_v57 = vpop.eup %1474  ;;  %v861_v0 = vmul.f32 1.442695, %v859_v58  ;;  %v805_v1 = vmul.f32 1.442695, %v803_v34 }
 0x244   : > { %v1477_v59 = vpop.eup %1476  ;;  %v707_v60 = vpack.c.bf16 %v1475_v57, %v1471_v55 }
 0x245   : > { %v651_v61 = vpack.c.bf16 %v1477_v59, %v1473_v56  ;;  %1478 = vpow2.f32 %v861_v0 }
 0x246   : > { %v708_v62 = vunpack.c.l.bf16 %v707_v60  ;;  %v709_v63 = vunpack.c.h.bf16 %v707_v60  ;;  %1341 = vmatmul.msk.bf16.vlgmr.msra.gmra.mxu1 %vm496_vm2, %v707_v60  ;;  %1480 = vpow2.f32 %v805_v1 }
 0x247   : > { %1340 = vmatmul.msk.bf16.vlgmr.msra.gmra.mxu0 %vm496_vm2, %v651_v61  ;;  %1042 = vmatpush.bf16.msra.mxu1 %v1778_v46  ;;  %v652_v26 = vunpack.c.l.bf16 %v651_v61  ;;  %v653_v28 = vunpack.c.h.bf16 %v651_v61 }
 0x248   : > { %v802_v2 = vpop.xlane.xlu1 %801  ;;  %v858_v4 = vpop.xlane.xlu0 %857  ;;  %v710_v5 = vsel %vm496_vm2, %v708_v62, 0.0  ;;  %v713_v3 = vsel %vm496_vm2, %v709_v63, 0.0  ;;  %987 = vmatpush.bf16.msra.mxu0 %v1778_v46  ;;  %v515_v46 = vsel %vm496_vm2, %v511_v15, 0.0 }
 0x249   : > { %v804_v6 = vsub.f32 %v1818_v10, %v802_v2  ;;  %v860_v7 = vsub.f32 %v1816_v9, %v858_v4  ;;  %711 = vadd.xlane.f32.xlu2 %v710_v5  ;;  %714 = vadd.xlane.f32.xlu0 %v713_v3  ;;  %v654_v35 = vsel %vm496_vm2, %v652_v26, 0.0 }
 0x24b   : > { %v807_v8 = vmul.f32 1.442695, %v804_v6  ;;  %v863_v11 = vmul.f32 1.442695, %v860_v7  ;;  %v1479_v20 = vpop.eup %1478 }
 0x24c   : > { %v1481_v10 = vpop.eup %1480 }
 0x24d   : > { %1482 = vpow2.f32 %v807_v8 }
 0x24e   : > { %1484 = vpow2.f32 %v863_v11 }
 0x250   : > { %v957_v16 = vpop.xlane.xlu1 %956  ;;  %v1013_v21 = vpop.xlane.xlu0 %1012 }
 0x251   : > { %513 = vadd.xlane.f32.xlu2 %v512_v19  ;;  %516 = vadd.xlane.f32.xlu0 %v515_v46  ;;  %v961_v22 = vsub.f32 %v1826_v14, %v957_v16  ;;  %v1017_v25 = vsub.f32 %v1824_v13, %v1013_v21  ;;  %v657_v13 = vsel %vm496_vm2, %v653_v28, 0.0 }
 0x253   : > { %v1483_v9 = vpop.eup %1482  ;;  %v963_v29 = vmul.f32 1.442695, %v961_v22  ;;  %v1019_v31 = vmul.f32 1.442695, %v1017_v25 }
 0x254   : > { %v1485_v23 = vpop.eup %1484  ;;  %v809_v24 = vpack.c.bf16 %v1483_v9, %v1481_v10 }
 0x255   : > { %v865_v27 = vpack.c.bf16 %v1485_v23, %v1479_v20  ;;  %1486 = vpow2.f32 %v963_v29 }
 0x256   : > { %1488 = vpow2.f32 %v1019_v31  ;;  %v810_v41 = vunpack.c.l.bf16 %v809_v24  ;;  %v811_v49 = vunpack.c.h.bf16 %v809_v24 }
 0x257   : > { %1345 = vmatmul.msk.bf16.vlgmr.msrb.gmra.mxu1 %vm496_vm2, %v865_v27  ;;  %v866_v30 = vunpack.c.l.bf16 %v865_v27  ;;  %1344 = vmatmul.msk.bf16.vlgmr.msrb.gmra.mxu0 %vm496_vm2, %v809_v24  ;;  %v867_v40 = vunpack.c.h.bf16 %v865_v27 }
 0x258   : > { %v960_v32 = vpop.xlane.xlu2 %959  ;;  %v1016_v33 = vpop.xlane.xlu1 %1015  ;;  %v815_v53 = vsel %vm496_vm2, %v811_v49, 0.0 }
 0x259   : > { %v962_v14 = vsub.f32 %v1834_v18, %v960_v32  ;;  %v1018_v36 = vsub.f32 %v1832_v17, %v1016_v33  ;;  %655 = vadd.xlane.f32.xlu2 %v654_v35  ;;  %v868_v37 = vsel %vm496_vm2, %v866_v30, 0.0  ;;  %658 = vadd.xlane.f32.xlu0 %v657_v13  ;;  %v871_v43 = vsel %vm496_vm2, %v867_v40, 0.0 }
 0x25a   : > { %869 = vadd.xlane.f32.xlu1 %v868_v37  ;;  %v812_v17 = vsel %vm496_vm2, %v810_v41, 0.0 }
 0x25b   : > { %v965_v38 = vmul.f32 1.442695, %v962_v14  ;;  %v1021_v39 = vmul.f32 1.442695, %v1018_v36  ;;  %v1487_v18 = vpop.eup %1486 }
 0x25c   : > { %v1489_v44 = vpop.eup %1488 }
 0x25d   : > { %1490 = vpow2.f32 %v965_v38 }
 0x25e   : > { %1492 = vpow2.f32 %v1021_v39 }
 0x261   : > { %872 = vadd.xlane.f32.xlu2 %v871_v43 }
 0x262   : > { %813 = vadd.xlane.f32.xlu1 %v812_v17 }
 0x263   : > { %v1491_v45 = vpop.eup %1490 }
 0x264   : > { %v1493_v47 = vpop.eup %1492  ;;  %v967_v48 = vpack.c.bf16 %v1491_v45, %v1487_v18 }
 0x265   : > { %v1023_v50 = vpack.c.bf16 %v1493_v47, %v1489_v44 }
 0x266   : > { %v969_v56 = vunpack.c.h.bf16 %v967_v48  ;;  %v968_v57 = vunpack.c.l.bf16 %v967_v48 }
 0x267   : > { %1349 = vmatmul.msk.bf16.vlgmr.msra.gmra.mxu1 %vm496_vm2, %v1023_v50  ;;  %v1025_v51 = vunpack.c.h.bf16 %v1023_v50  ;;  %v1024_v52 = vunpack.c.l.bf16 %v1023_v50  ;;  %1348 = vmatmul.msk.bf16.vlgmr.msra.gmra.mxu0 %vm496_vm2, %v967_v48 }
 0x268   : > { %v973_v58 = vsel %vm496_vm2, %v969_v56, 0.0  ;;  %v970_v59 = vsel %vm496_vm2, %v968_v57, 0.0 }
 0x269   : > { %816 = vadd.xlane.f32.xlu2 %v815_v53  ;;  %v1029_v54 = vsel %vm496_vm2, %v1025_v51, 0.0  ;;  %v1026_v55 = vsel %vm496_vm2, %v1024_v52, 0.0 }
 0x26a   : > { %1030 = vadd.xlane.f32.xlu1 %v1029_v54  ;;  %1027 = vadd.xlane.f32.xlu0 %v1026_v55 }
 0x272   : > { %974 = vadd.xlane.f32.xlu1 %v973_v58  ;;  %971 = vadd.xlane.f32.xlu0 %v970_v59 }
 0x2b3   : > { %v1881_v63 = vpop.f32.mrf.mxu1 }
 0x2b4   : > { %v531_v60 = vpop.f32.mrf.mxu0 }
 0x2bb   : > { %v1883_v4 = vpop.f32.mrf.mxu1 }
 0x2bc   : > { %v712_v34 = vpop.xlane.xlu2 %711  ;;  %v533_v61 = vpop.f32.mrf.mxu0 }
 0x2bd   : > { %v715_v62 = vpop.xlane.xlu0 %714 }
 0x2c3   : > { %v728_v21 = vpop.f32.mrf.mxu1 }
 0x2c4   : > { %v514_v0 = vpop.xlane.xlu2 %513  ;;  %v673_v1 = vpop.f32.mrf.mxu0 }
 0x2c5   : > { %1494 = vrcp.f32 %v514_v0  ;;  %v517_v2 = vpop.xlane.xlu0 %516 }
 0x2c6   : > { %1496 = vrcp.f32 %v517_v2 }
 0x2cb   : > { %v1495_v5 = vpop.eup %1494  ;;  %v730_v14 = vpop.f32.mrf.mxu1 }
 0x2cc   : > { %v1497_v3 = vpop.eup %1496  ;;  %v656_v6 = vpop.xlane.xlu2 %655  ;;  %v538_v7 = vmul.f32 %v1495_v5, %v531_v60  ;;  %v559_v5 = vunpack.c.h.bf16 %v1842_v42 }
 0x2cd   : > { %v675_v8 = vpop.f32.mrf.mxu0  ;;  %1498 = vrcp.f32 %v656_v6  ;;  %v870_v11 = vpop.xlane.xlu1 %869  ;;  %v539_v12 = vmul.f32 %v1497_v3, %v533_v61 }
 0x2ce   : > { %v659_v15 = vpop.xlane.xlu0 %658  ;;  %v540_v16 = vpack.c.bf16 %v538_v7, %v538_v7  ;;  %v563_v3 = vsel %vm496_vm2, %v559_v5, 0.0 }
 0x2cf   : > { %1500 = vrcp.f32 %v659_v15  ;;  %v541_v19 = vpack.c.bf16 %v539_v12, %v539_v12 }
 0x2d0   : > { %543 = vst.msk [vmem:[#allocation2] sm:$0xf] %vm542_vm3, %v540_v16  ;;  %1502 = vrcp.f32 %v712_v34  ;;  %v1387_v16 = vld [vmem:[%s2003_s4 + $0x8] sm:$0xff] }
 0x2d1   : > { %544 = vst.msk [vmem:[#allocation2 + $0x4] sm:$0xf] %vm542_vm3, %v541_v19  ;;  %1111 = vmatpush.bf16.msrb.mxu2 %v1387_v16 }
 0x2d3   : > { %v1499_v20 = vpop.eup %1498 }
 0x2d4   : > { %v873_v46 = vpop.xlane.xlu2 %872  ;;  %v680_v10 = vmul.f32 %v1499_v20, %v673_v1  ;;  %v886_v47 = vpop.f32.mrf.mxu1  ;;  %v558_v1 = vunpack.c.l.bf16 %v1842_v42  ;;  %v1386_v42 = vld [vmem:[%s2003_s4] sm:$0xff] }
 0x2d5   : > { %v1501_v9 = vpop.eup %1500  ;;  %v831_v22 = vpop.f32.mrf.mxu0  ;;  %1112 = vmatpush.bf16.msrb.mxu2 %v1386_v42 }
 0x2d6   : > { %v814_v23 = vpop.xlane.xlu1 %813  ;;  %v682_v24 = vpack.c.bf16 %v680_v10, %v680_v10  ;;  %v681_v25 = vmul.f32 %v1501_v9, %v675_v8  ;;  %v1503_v27 = vpop.eup %1502  ;;  %v560_v2 = vsel %vm496_vm2, %v558_v1, 0.0 }
 0x2d7   : > { %1504 = vrcp.f32 %v814_v23  ;;  %v735_v29 = vmul.f32 %v1503_v27, %v728_v21 }
 0x2d8   : > { %686 = vrot.lane.b32.xlu1 %v682_v24, %s2008_s8  ;;  %v683_v26 = vpack.c.bf16 %v681_v25, %v681_v25  ;;  %1506 = vrcp.f32 %v715_v62 }
 0x2d9   : > { %v737_v13 = vpack.c.bf16 %v735_v29, %v735_v29 }
 0x2da   : > { %688 = vrot.lane.b32.xlu2 %v683_v26, %s2008_s8 }
 0x2dc   : > { %v817_v30 = vpop.xlane.xlu2 %816  ;;  %v888_v56 = vpop.f32.mrf.mxu1 }
 0x2dd   : > { %v1505_v28 = vpop.eup %1504  ;;  %v833_v31 = vpop.f32.mrf.mxu0  ;;  %1508 = vrcp.f32 %v817_v30 }
 0x2de   : > { %v838_v32 = vmul.f32 %v1505_v28, %v831_v22  ;;  %v1031_v33 = vpop.xlane.xlu1 %1030  ;;  %v1028_v35 = vpop.xlane.xlu0 %1027  ;;  %1510 = vrcp.f32 %v870_v11 }
 0x2df   : > { %v1507_v37 = vpop.eup %1506 }
 0x2e0   : > { %v840_v36 = vpack.c.bf16 %v838_v32, %v838_v32  ;;  %v736_v39 = vmul.f32 %v1507_v37, %v730_v14 }
 0x2e2   : > { %844 = vrot.lane.b32.xlu0 %v840_v36, %s1646_s10  ;;  %741 = vrot.lane.b32.xlu2 %v737_v13, %s2008_s8  ;;  %v738_v17 = vpack.c.bf16 %v736_v39, %v736_v39 }
 0x2e3   : > { %v1509_v38 = vpop.eup %1508 }
 0x2e4   : > { %v839_v40 = vmul.f32 %v1509_v38, %v833_v31  ;;  %v1511_v45 = vpop.eup %1510  ;;  %v1044_v61 = vpop.f32.mrf.mxu1 }
 0x2e5   : > { %v989_v18 = vpop.f32.mrf.mxu0  ;;  %v893_v48 = vmul.f32 %v1511_v45, %v886_v47 }
 0x2e6   : > { %v972_v41 = vpop.xlane.xlu0 %971  ;;  %v841_v43 = vpack.c.bf16 %v839_v40, %v839_v40  ;;  %v975_v44 = vpop.xlane.xlu1 %974 }
 0x2e7   : > { %1512 = vrcp.f32 %v972_v41  ;;  %v895_v51 = vpack.c.bf16 %v893_v48, %v893_v48 }
 0x2e8   : > { %846 = vrot.lane.b32.xlu1 %v841_v43, %s1646_s10  ;;  %1514 = vrcp.f32 %v975_v44 }
 0x2e9   : > { %1516 = vrcp.f32 %v873_v46 }
 0x2ea   : > { %743 = vrot.lane.b32.xlu2 %v738_v17, %s2008_s8  ;;  %1518 = vrcp.f32 %v1028_v35 }
 0x2eb   : > { %1520 = vrcp.f32 %v1031_v33 }
 0x2ec   : > { %v1046_v6 = vpop.f32.mrf.mxu1 }
 0x2ed   : > { %v1513_v49 = vpop.eup %1512  ;;  %v991_v54 = vpop.f32.mrf.mxu0 }
 0x2ee   : > { %v996_v50 = vmul.f32 %v1513_v49, %v989_v18  ;;  %v1515_v53 = vpop.eup %1514 }
 0x2ef   : > { %v997_v55 = vmul.f32 %v1515_v53, %v991_v54  ;;  %v1517_v58 = vpop.eup %1516 }
 0x2f0   : > { %v998_v52 = vpack.c.bf16 %v996_v50, %v996_v50  ;;  %v894_v59 = vmul.f32 %v1517_v58, %v888_v56  ;;  %v1519_v34 = vpop.eup %1518 }
 0x2f1   : > { %v999_v57 = vpack.c.bf16 %v997_v55, %v997_v55  ;;  %v1051_v62 = vmul.f32 %v1519_v34, %v1044_v61  ;;  %v1521_v7 = vpop.eup %1520 }
 0x2f2   : > { %899 = vrot.lane.b32.xlu2 %v895_v51, %s1646_s10  ;;  %1002 = vrot.lane.b32.xlu0 %v998_v52, %s1647_s12  ;;  %v896_v60 = vpack.c.bf16 %v894_v59, %v894_v59  ;;  %v1052_v8 = vmul.f32 %v1521_v7, %v1046_v6 }
 0x2f3   : > { %v1053_v0 = vpack.c.bf16 %v1051_v62, %v1051_v62 }
 0x2f4   : > { %v1054_v11 = vpack.c.bf16 %v1052_v8, %v1052_v8 }
 0x2fa   : > { %1004 = vrot.lane.b32.xlu2 %v999_v57, %s1647_s12 }
 0x302   : > { %901 = vrot.lane.b32.xlu2 %v896_v60, %s1646_s10  ;;  %s1546_s10 = scalar_lea.hbm %s2005_s6, 32 }
 0x303   : > { %p1548_p2 = scmp.lt.s32.totalorder %s1546_s10, %s1542_s22 }
 0x305   : > { %p1549_p3 = por %p1548_p2, %p1547_p1 }
 0x307   : > { %p1550_p5 = pnand %p1549_p3, %p1545_p0 }
 0x30a   : > { %1057 = vrot.lane.b32.xlu2 %v1053_v0, %s1647_s12 }
 0x312   : > { %561 = vadd.xlane.f32.xlu1 %v560_v2 }
 0x31c   : > { %564 = vadd.xlane.f32.xlu0 %v563_v3 }
 0x32b   : > { %1059 = vrot.lane.b32.xlu1 %v1054_v11, %s1647_s12 }
 0x334   : > { %v689_v12 = vpop.permute.xlu2 %688 }
 0x335   : > { %694 = vst.msk [vmem:[#allocation2 + $0x4] sm:$0xf] %vm692_vm4, %v689_v12 }
 0x33c   : > { %v742_v15 = vpop.permute.xlu2 %741 }
 0x344   : > { %v744_v19 = vpop.permute.xlu2 %743 }
 0x34a   : > { %v687_v20 = vpop.permute.xlu1 %686 }
 0x34b   : > { %693 = vst.msk [vmem:[#allocation2] sm:$0xf] %vm692_vm4, %v687_v20 }
 0x34c   : > { %v900_v21 = vpop.permute.xlu2 %899 }
 0x354   : > { %v845_v46 = vpop.permute.xlu0 %844  ;;  %v1005_v9 = vpop.permute.xlu2 %1004 }
 0x355   : > { %851 = vst.msk [vmem:[#allocation2] sm:$0xf] %vm850_vm5, %v845_v46 }
 0x35a   : > { %v847_v10 = vpop.permute.xlu1 %846 }
 0x35b   : > { %852 = vst.msk [vmem:[#allocation2 + $0x4] sm:$0xf] %vm850_vm5, %v847_v10 }
 0x35c   : > { %1010 = vst.msk [vmem:[#allocation2 + $0x4] sm:$0xf] %vm1008_vm6, %v1005_v9  ;;  %v902_v25 = vpop.permute.xlu2 %901 }
 0x364   : > { %v1003_v22 = vpop.permute.xlu0 %1002  ;;  %v1058_v30 = vpop.permute.xlu2 %1057 }
 0x365   : > { %1009 = vst.msk [vmem:[#allocation2] sm:$0xf] %vm1008_vm6, %v1003_v22 }
 0x36c   : > { %v1384_v23 = vld [vmem:[#allocation2] sm:$0xff] }
 0x36d   : > { %1366 = vmatmul.msk.bf16.vlgmr.msrb.gmra.mxu2 %vm368_vm0, %v1384_v23 }
 0x385   : > { %v562_v24 = vpop.xlane.xlu1 %561 }
 0x386   : > { %1522 = vrcp.f32 %v562_v24 }
 0x38c   : > { %v1523_v26 = vpop.eup %1522 }
 0x38d   : > { %v585_v27 = vmul.f32 %v1523_v26, %v1881_v63 }
 0x38f   : > { %v587_v28 = vpack.c.bf16 %v585_v27, %v585_v27  ;;  %v565_v29 = vpop.xlane.xlu0 %564 }
 0x390   : > { %1524 = vrcp.f32 %v565_v29 }
 0x391   : > { %589 = vst.msk [vmem:[#allocation2 + $0x8] sm:$0xf] %vm542_vm3, %v587_v28 }
 0x392   : > { %747 = vst.msk [vmem:[#allocation2 + $0x8] sm:$0xf] %vm692_vm4, %v742_v15 }
 0x393   : > { %905 = vst.msk [vmem:[#allocation2 + $0x8] sm:$0xf] %vm850_vm5, %v900_v21 }
 0x394   : > { %1063 = vst.msk [vmem:[#allocation2 + $0x8] sm:$0xf] %vm1008_vm6, %v1058_v30 }
 0x396   : > { %v1525_v31 = vpop.eup %1524 }
 0x397   : > { %v586_v32 = vmul.f32 %v1525_v31, %v1883_v4  ;;  %v1461_v4 = vld [vmem:[%s2004_s5] ss:$0 sm:$0xff] }
 0x399   : > { %v588_v33 = vpack.c.bf16 %v586_v32, %v586_v32 }
 0x39b   : > { %590 = vst.msk [vmem:[#allocation2 + $0xc] sm:$0xf] %vm542_vm3, %v588_v33 }
 0x39c   : > { %748 = vst.msk [vmem:[#allocation2 + $0xc] sm:$0xf] %vm692_vm4, %v744_v19 }
 0x39d   : > { %v1060_v63 = vpop.permute.xlu1 %1059  ;;  %906 = vst.msk [vmem:[#allocation2 + $0xc] sm:$0xf] %vm850_vm5, %v902_v25 }
 0x39e   : > { %1064 = vst.msk [vmem:[#allocation2 + $0xc] sm:$0xf] %vm1008_vm6, %v1060_v63 }
 0x3a5   : > { %v1385_v35 = vld [vmem:[#allocation2 + $0x8] sm:$0xff] }
 0x3a6   : > { %1367 = vmatmul.msk.bf16.gmra.mxu2 %vm368_vm0, %v1385_v35 }
 0x3f0   : > { %v1114_v14 = vpop.f32.mrf.mxu2 }
 0x3f1   : > { %v1115_v36 = vadd.f32 %v1461_v4, %v1114_v14 }
 0x3f3   : > { %1124 = vst.msk [vmem:[%s317_s30] sm:$0xff] %vm368_vm0, %v1115_v36 }
 0x3f8   : > { %v1116_v13 = vpop.f32.mrf.mxu2 }
 0x3f9   : > { %v1117_v37 = vadd.f32 %v1461_v4, %v1116_v13 }
 0x3fb   : > { %1125 = vst.msk [vmem:[%s317_s30 + $0x8] sm:$0xff] %vm368_vm0, %v1117_v37 }
 0x3fc   : > { %1553 = shalt.err (!%p1550_p5)
}
 0x3fd   : > { %s1648_s30 = smov 128   ;;  %s2015_s23 = smov 8  }
 0x3fe   : > { %1390 = dma.vmem_to_hbm [thread:$0]  (%p1729_p4), %s1149_s16, 256, %s1151_s17, %s1129_s18, %s1648_s30, %s1648_s30, %s2015_s23  }
 0x3ff   : > { %s2016_s8 = sshll.u32 %s1924_s19, 4  ;;  %s2017_s21 = sshll.u32 %s1628_s27, 4 }
 0x400   : > { %s324_s20 = scalar_lea.vmem [#allocation5], %s2016_s8  ;;  %s1166_s12 = scalar_lea.hbm %s2006_s7, %s2017_s21 }
 0x401   : > { %s1167_s15 = sshll.u32 %s324_s20, 4  ;;  %s1169_s0 = sshll.u32 %s1166_s12, 4  ;;  %s1168_s15 = int_to_ptr.vmem [resolvable:$true] %s1167_s15  ;;  %s1170_s0 = int_to_ptr.hbm [resolvable:$true] %s1169_s0 }
 0x402   : > { %s1134_s16 = scalar_lea.sflag [#allocation6], %s1924_s19  ;;  %s1568_s17 = sshra.s32 %s1170_s0, 4  ;;  %s1569_s17 = int_to_ptr.hbm [resolvable:$true] %s1568_s17 }
 0x403   : > { %s1570_s18 = scalar_lea.hbm %s1569_s17, 16  ;;  %s1574_s21 = scalar_lea.hbm %s2006_s7, 32 }
 0x404   : > { %p1571_p6 = scmp.ne.s32.totalorder %s1569_s17, %s1570_s18  ;;  %p1575_p10 = scmp.lt.s32.totalorder %s1569_s17, %s2006_s7 }
 0x405   : > { %p1576_p11 = scmp.lt.s32.totalorder %s1574_s21, %s1570_s18 }
 0x406   : > { %p1572_p7 = pnand %p1571_p6, %p1729_p4 }
 0x407   : > { %p1577_p12 = por %p1576_p11, %p1575_p10 }
 0x408   : > { %p1573_p9 = pneg %p1572_p7 }
 0x40a   : > { %p1578_p13 = pnand %p1577_p12, %p1573_p9 }
 0x429   : > { %v1119_v38 = vpop.f32.mrf.mxu2 }
 0x42a   : > { %v1120_v39 = vadd.f32 %v1461_v4, %v1119_v38 }
 0x42c   : > { %1126 = vst.msk [vmem:[%s324_s20] sm:$0xff] %vm368_vm0, %v1120_v39 }
 0x431   : > { %v1121_v40 = vpop.f32.mrf.mxu2 }
 0x432   : > { %v1122_v41 = vadd.f32 %v1461_v4, %v1121_v40 }
 0x434   : > { %1127 = vst.msk [vmem:[%s324_s20 + $0x8] sm:$0xff] %vm368_vm0, %v1122_v41 }
 0x435   : > { %1581 = shalt.err (!%p1578_p13)
}
 0x436   : > { %1391 = dma.vmem_to_hbm [thread:$0]  (%p1729_p4), %s1168_s15, 256, %s1170_s0, %s1134_s16, %s1648_s30, %s1648_s30, %s2015_s23  }
 0x437 PF: > { %p1401_p0 = scmp.ge.s32.totalorder %s1636_s29, 2  ;;  %s1184_s19 = sand.u32 1, %s1616_s24  }
 0x438   : > { %s1185_s20 = scalar_lea.sflag [#allocation4], %s1184_s19 }
 0x439   : > { %p1395_p1 = pnand %p1401_p0, %p1736_p8 }
 0x43b   : > { %p1396_p2 = pneg %p1395_p1 }
 0x43d   : > { %1607 = dma.done.wait (%p1396_p2), %s1185_s20, 256  }
 0x43e   : > { %1609 = vsyncadd (%p1396_p2), %s1185_s20, 4294967040  ;;  %s1195_s12 = scalar_lea.sflag [#allocation6], %s1184_s19 }
 0x43f   : > { %1611 = dma.done.wait (%p1396_p2), %s1195_s12, 256  }
 0x440   : > { %1613 = vsyncadd (%p1396_p2), %s1195_s12, 4294967040  ;;  %s24_s29 = sadd.s32 1, %s1636_s29   ;;  %s2018_s24 = smov %s1620_s25 }
 0x441   : > { %p21_p3 = scmp.ge.s32.totalorder %s24_s29, 4   ;;  %s2019_s25 = smov %s1624_s26 }
 0x442   : > { %s2020_s26 = smov %s1742_s14  ;;  %s2021_s27 = smov %s1632_s28 }
 0x443   : > { %s2022_s28 = smov %s2024_s9  ;;  %23 = sbr.rel (!%p21_p3) target bundleno = 8 (0x8), region = 99 }
 0x448   :  { %1201 = vsyncpa [#allocation4], 1 }
 0x449   :  { %1203 = vsyncpa [#allocation4 + $0x1], 1 }
 0x44a   :  { %1204 = vsyncpa [#allocation6], 1 }
 0x44b   :  { %1206 = vsyncpa [#allocation6 + $0x1], 1 }

</bundles_post_ra>
